<compile_context>
chip_gen: v6e
topology: v6e:2x2x1
jax: 0.10.0
libtpu: 0.0.40
codegen_flags: <defaults>
</compile_context>

<pallas_src>
import functools

import jax
import jax.numpy as jnp
from jax import lax
from jax.experimental import pallas as pl
from jax.experimental.pallas import tpu as pltpu


# ---------------------------------------------------------------------------
# Tile selection: lane dims need multiples of 128, sublane dims multiples of 8
# (or the full array dim).  Caps keep double-buffered tiles well inside the
# default scoped-VMEM budget on all generations (v5e 16 MiB ... v7x 32 MiB).
# ---------------------------------------------------------------------------
def _pick_tile(dim, align, max_tile):
    best = None
    t = align
    while t <= min(dim, max_tile):
        if dim % t == 0:
            best = t
        t += align
    return best if best is not None else dim


# ---------------------------------------------------------------------------
# Kernel 1: tiled matmul (optionally + bias), bf16 MXU inputs, f32 accumulator
# ---------------------------------------------------------------------------
def _matmul_kernel(x_ref, w_ref, o_ref, acc_ref, *, compute_dtype):
    @pl.when(pl.program_id(2) == 0)
    def _():
        acc_ref[...] = jnp.zeros_like(acc_ref)

    acc_ref[...] += jnp.dot(
        x_ref[...].astype(compute_dtype),
        w_ref[...].astype(compute_dtype),
        preferred_element_type=jnp.float32)

    @pl.when(pl.program_id(2) == pl.num_programs(2) - 1)
    def _():
        o_ref[...] = acc_ref[...].astype(o_ref.dtype)


def _matmul_bias_kernel(x_ref, w_ref, b_ref, o_ref, acc_ref, *, compute_dtype):
    @pl.when(pl.program_id(2) == 0)
    def _():
        acc_ref[...] = jnp.zeros_like(acc_ref)

    acc_ref[...] += jnp.dot(
        x_ref[...].astype(compute_dtype),
        w_ref[...].astype(compute_dtype),
        preferred_element_type=jnp.float32)

    @pl.when(pl.program_id(2) == pl.num_programs(2) - 1)
    def _():
        o_ref[...] = (acc_ref[...] + b_ref[...].astype(jnp.float32)
                      ).astype(o_ref.dtype)


def matmul(x, w, bias=None, *, compute_dtype=jnp.bfloat16, out_dtype=None):
    """x: (M, K), w: (K, Nout), bias: optional (Nout,) -> (M, Nout)."""
    M, K = x.shape
    K2, Nout = w.shape
    assert K == K2
    out_dtype = out_dtype or x.dtype

    tm = _pick_tile(M, 8, 512)       # sublane-aligned
    tn = _pick_tile(Nout, 128, 256)  # lane-aligned
    tk = _pick_tile(K, 128, 256)     # lane-aligned
    grid = (M // tm, Nout // tn, K // tk)

    in_specs = [
        pl.BlockSpec((tm, tk), lambda i, j, k: (i, k)),
        pl.BlockSpec((tk, tn), lambda i, j, k: (k, j)),
    ]
    args = [x, w]
    if bias is None:
        kernel = functools.partial(_matmul_kernel, compute_dtype=compute_dtype)
    else:
        in_specs.append(pl.BlockSpec((1, tn), lambda i, j, k: (0, j)))
        args.append(bias.reshape(1, Nout))
        kernel = functools.partial(_matmul_bias_kernel,
                                   compute_dtype=compute_dtype)

    return pl.pallas_call(
        kernel,
        out_shape=jax.ShapeDtypeStruct((M, Nout), out_dtype),
        grid_spec=pltpu.PrefetchScalarGridSpec(
            num_scalar_prefetch=0,
            grid=grid,
            in_specs=in_specs,
            out_specs=pl.BlockSpec((tm, tn), lambda i, j, k: (i, j)),
            scratch_shapes=[pltpu.VMEM((tm, tn), jnp.float32)]),
        compiler_params=pltpu.CompilerParams(
            dimension_semantics=("parallel", "parallel", "arbitrary")),
    )(*args)


# ---------------------------------------------------------------------------
# Kernel 2: multi-head scaled-dot-product attention.
#   One batch element per grid step, all heads computed inside the kernel.
#   Input  block: (N, 3C) slab of the fused qkv projection (no HBM transpose).
#   Output block: (N, C)  lane-dense slab (merge-heads is a free reshape).
# ---------------------------------------------------------------------------
def _attention_kernel(qkv_ref, o_ref, *, num_heads, head_dim, scale,
                      compute_dtype):
    qkv = qkv_ref[...]                           # (N, 3C)
    C = num_heads * head_dim
    for h in range(num_heads):                   # static unroll over heads
        q = qkv[:, h * head_dim:(h + 1) * head_dim].astype(jnp.float32)
        q = (q * scale).astype(compute_dtype)    # fold scale into q (N*D mults)
        k = qkv[:, C + h * head_dim: C + (h + 1) * head_dim].astype(compute_dtype)
        v = qkv[:, 2 * C + h * head_dim: 2 * C + (h + 1) * head_dim].astype(compute_dtype)

        # q @ k^T without materializing k.T (contract last dims directly).
        s = lax.dot_general(q, k, (((1,), (1,)), ((), ())),
                            preferred_element_type=jnp.float32)   # (N, N)
        m = jnp.max(s, axis=-1, keepdims=True)
        p = jnp.exp(s - m)                                        # f32 softmax
        denom = jnp.sum(p, axis=-1, keepdims=True)
        p = p * pl.reciprocal(denom, approx=True)                 # EUP slot
        o_h = jnp.dot(p.astype(compute_dtype), v,
                      preferred_element_type=jnp.float32)         # (N, D)
        o_ref[:, h * head_dim:(h + 1) * head_dim] = o_h.astype(o_ref.dtype)


def sdpa_fused(qkv, num_heads, scale, *, compute_dtype=jnp.bfloat16,
               out_dtype=jnp.float32):
    """qkv: (B, N, 3C) fused projection -> (B, N, C) attention output."""
    B, N, threeC = qkv.shape
    C = threeC // 3
    head_dim = C // num_heads
    return pl.pallas_call(
        functools.partial(_attention_kernel, num_heads=num_heads,
                          head_dim=head_dim, scale=scale,
                          compute_dtype=compute_dtype),
        out_shape=jax.ShapeDtypeStruct((B, N, C), out_dtype),
        grid=(B,),
        in_specs=[pl.BlockSpec((None, N, threeC), lambda b: (b, 0, 0))],
        out_specs=pl.BlockSpec((None, N, C), lambda b: (b, 0, 0)),
        compiler_params=pltpu.CompilerParams(
            dimension_semantics=("parallel",)),
    )(qkv)


# ---------------------------------------------------------------------------
# Attention module forward (qkv_bias=False, qk_norm=False, dropouts are 0.0)
# ---------------------------------------------------------------------------
def attention_forward(x, params, num_heads, *, compute_dtype=jnp.bfloat16):
    B, N, C = x.shape
    head_dim = C // num_heads
    scale = head_dim ** (-0.5)

    # 1. fused qkv projection (no bias: qkv_bias=False)
    qkv = matmul(x.reshape(B * N, C), params["w_qkv_t"],
                 compute_dtype=compute_dtype)                 # (B*N, 3C)
    qkv = qkv.reshape(B, N, 3 * C)                            # free view

    # 2+3. multi-head attention straight from the fused qkv slab
    o = sdpa_fused(qkv, num_heads, scale, compute_dtype=compute_dtype,
                   out_dtype=x.dtype)                         # (B, N, C)

    # 4. output projection (+ bias); merge-heads was done lane-wise in-kernel
    y = matmul(o.reshape(B * N, C), params["w_proj_t"], params["b_proj"],
               compute_dtype=compute_dtype)                   # (B*N, C)
    return y.reshape(B, N, C)


def init_params(key, dim):
    k1, k2, k3 = jax.random.split(key, 3)
    # PyTorch Linear weights are (out, in); store transposed (in, out).
    w_qkv = jax.random.normal(k1, (3 * dim, dim), jnp.float32) * 0.02
    w_proj = jax.random.normal(k2, (dim, dim), jnp.float32) * 0.02
    b_proj = jax.random.normal(k3, (dim,), jnp.float32) * 0.02
    return {"w_qkv_t": w_qkv.T, "w_proj_t": w_proj.T, "b_proj": b_proj}


# ---------------------------------------------------------------------------
# JAX glue matching SimpleMoEBlock's window-partitioned expert call path
# ---------------------------------------------------------------------------
def windows_partition(x, window_size):
    B, C, H, W = x.shape
    x = x.reshape(B, C, H // window_size, window_size, W // window_size,
                  window_size)
    x = jnp.transpose(x, (0, 2, 4, 3, 5, 1))
    return x.reshape(-1, window_size * window_size, C)


def windows_reverse(x, window_size, H, W):
    nW = (H // window_size) * (W // window_size)
    B = x.shape[0] // nW
    C = x.shape[-1]
    x = x.reshape(B, H // window_size, W // window_size, window_size,
                  window_size, C)
    x = jnp.transpose(x, (0, 5, 1, 3, 2, 4))
    return x.reshape(B, C, H, W)


# ---------------------------------------------------------------------------
# Pure-JAX f32 reference for correctness checks
# ---------------------------------------------------------------------------
def attention_reference(x, params, num_heads):
    B, N, C = x.shape
    D = C // num_heads
    scale = D ** (-0.5)
    qkv = x.reshape(B * N, C) @ params["w_qkv_t"]
    qkv = qkv.reshape(B, N, 3, num_heads, D)
    qkv = jnp.transpose(qkv, (2, 0, 3, 1, 4))
    q, k, v = qkv[0], qkv[1], qkv[2]
    s = jnp.einsum("bhnd,bhmd->bhnm", q, k) * scale
    p = jax.nn.softmax(s, axis=-1)
    o = jnp.einsum("bhnm,bhmd->bhnd", p, v)
    o = jnp.transpose(o, (0, 2, 1, 3)).reshape(B * N, C)
    y = o @ params["w_proj_t"] + params["b_proj"]
    return y.reshape(B, N, C)


if __name__ == "__main__":
    key = jax.random.PRNGKey(0)
    kx, kp, ki = jax.random.split(key, 3)

    C, num_heads = 32, 4              # head_dim = 8
    params = init_params(kp, C)

    # --- test 1: plain (B, N, C) attention ---------------------------------
    B, N = 2, 8
    x = jax.random.normal(kx, (B, N, C), jnp.float32)
    y = jax.block_until_ready(attention_forward(x, params, num_heads))
    y_ref = attention_reference(x, params, num_heads)
    assert y.shape == (B, N, C)
    # bf16 MXU inputs + approx reciprocal -> loosened tolerance vs f32 ref
    assert jnp.allclose(y, y_ref, atol=3e-2, rtol=3e-2), "mismatch (test 1)"

    # --- test 2: window-partitioned path as SimpleMoEBlock calls the expert -
    Bimg, Himg, Wimg, ws = 2, 14, 14, 7          # 2x2 windows of 7x7 tokens
    x_img = jax.random.normal(ki, (Bimg, C, Himg, Wimg), jnp.float32)
    x_win = windows_partition(x_img, ws)         # (B*nW, 49, C)
    y_win = jax.block_until_ready(attention_forward(x_win, params, num_heads))
    y_win_ref = attention_reference(x_win, params, num_heads)
    assert jnp.allclose(y_win, y_win_ref, atol=3e-2, rtol=3e-2), "mismatch (test 2)"
    y_img = windows_reverse(y_win, ws, Himg, Wimg)
    assert y_img.shape == x_img.shape

    print("KERNEL_OK")
</pallas_src>

<mosaic_0001>
module attributes {stable_mosaic.version = 11 : i64} {
  func.func @_matmul_kernel(%arg0: i32, %arg1: i32, %arg2: i32, %arg3: memref<16x32xf32, #tpu.memory_space<vmem>>, %arg4: memref<32x96xf32, #tpu.memory_space<vmem>>, %arg5: memref<16x96xf32, #tpu.memory_space<vmem>>, %arg6: memref<16x96xf32, #tpu.memory_space<vmem>>) attributes {dimension_semantics = [#tpu.dimension_semantics<parallel>, #tpu.dimension_semantics<parallel>, #tpu.dimension_semantics<arbitrary>], iteration_bounds = array<i64: 1, 1, 1>, scalar_prefetch = 0 : i64, scratch_operands = 1 : i64, tpu.core_type = #tpu.core_type<tc>, window_params = [{transform_indices = @transform_0, window_bounds = array<i64: 16, 32>}, {transform_indices = @transform_1, window_bounds = array<i64: 32, 96>}, {transform_indices = @transform_2, window_bounds = array<i64: 16, 96>}]} {
    %c0_i32 = arith.constant 0 : i32
    %0 = arith.cmpi eq, %arg2, %c0_i32 : i32
    %1 = arith.extui %0 : i1 to i32
    %c0_i32_0 = arith.constant 0 : i32
    %2 = arith.cmpi ne, %1, %c0_i32_0 : i32
    scf.if %2 {
      %cst_10 = arith.constant 0.000000e+00 : f32
      %14 = vector.broadcast %cst_10 : f32 to vector<16x96xf32>
      %c0_11 = arith.constant 0 : index
      %c0_12 = arith.constant 0 : index
      %15 = vector.load %arg6[%c0_11, %c0_12] : memref<16x96xf32, #tpu.memory_space<vmem>>, vector<16x96xf32>
      tpu.vector_store %arg6[%c0_11, %c0_12], %14 {strides = array<i32>} : memref<16x96xf32, #tpu.memory_space<vmem>>, vector<16x96xf32>,
    } else {
    }
    %c0 = arith.constant 0 : index
    %c0_1 = arith.constant 0 : index
    %3 = vector.load %arg6[%c0, %c0_1] : memref<16x96xf32, #tpu.memory_space<vmem>>, vector<16x96xf32>
    %c0_2 = arith.constant 0 : index
    %c0_3 = arith.constant 0 : index
    %4 = vector.load %arg3[%c0_2, %c0_3] : memref<16x32xf32, #tpu.memory_space<vmem>>, vector<16x32xf32>
    %5 = arith.truncf %4 : vector<16x32xf32> to vector<16x32xbf16>
    %c0_4 = arith.constant 0 : index
    %c0_5 = arith.constant 0 : index
    %6 = vector.load %arg4[%c0_4, %c0_5] : memref<32x96xf32, #tpu.memory_space<vmem>>, vector<32x96xf32>
    %7 = arith.truncf %6 : vector<32x96xf32> to vector<32x96xbf16>
    %cst = arith.constant dense<0.000000e+00> : vector<16x96xf32>
    %8 = tpu.matmul %5, %7, %cst {dimension_numbers = #tpu.dot_dimension_numbers<[1], [0], [0], [1], [0, 0, 1, 1], [], []>} : vector<16x32xbf16>, vector<32x96xbf16>, vector<16x96xf32> -> vector<16x96xf32>
    %9 = arith.addf %3, %8 : vector<16x96xf32>
    %c0_6 = arith.constant 0 : index
    %c0_7 = arith.constant 0 : index
    %10 = vector.load %arg6[%c0_6, %c0_7] : memref<16x96xf32, #tpu.memory_space<vmem>>, vector<16x96xf32>
    tpu.vector_store %arg6[%c0_6, %c0_7], %9 {strides = array<i32>} : memref<16x96xf32, #tpu.memory_space<vmem>>, vector<16x96xf32>,
    %c0_i32_8 = arith.constant 0 : i32
    %11 = arith.cmpi eq, %arg2, %c0_i32_8 : i32
    %12 = arith.extui %11 : i1 to i32
    %c0_i32_9 = arith.constant 0 : i32
    %13 = arith.cmpi ne, %12, %c0_i32_9 : i32
    scf.if %13 {
      %c0_10 = arith.constant 0 : index
      %c0_11 = arith.constant 0 : index
      %14 = vector.load %arg6[%c0_10, %c0_11] : memref<16x96xf32, #tpu.memory_space<vmem>>, vector<16x96xf32>
      %c0_12 = arith.constant 0 : index
      %c0_13 = arith.constant 0 : index
      %15 = vector.load %arg5[%c0_12, %c0_13] : memref<16x96xf32, #tpu.memory_space<vmem>>, vector<16x96xf32>
      tpu.vector_store %arg5[%c0_12, %c0_13], %14 {strides = array<i32>} : memref<16x96xf32, #tpu.memory_space<vmem>>, vector<16x96xf32>,
    } else {
    }
    return
  }
  func.func @transform_0(%arg0: i32, %arg1: i32, %arg2: i32) -> (i32, i32) {
    %c0_i32 = arith.constant 0 : i32
    return %arg0, %arg2 : i32, i32
  }
  func.func @transform_1(%arg0: i32, %arg1: i32, %arg2: i32) -> (i32, i32) {
    %c0_i32 = arith.constant 0 : i32
    return %arg2, %arg1 : i32, i32
  }
  func.func @transform_2(%arg0: i32, %arg1: i32, %arg2: i32) -> (i32, i32) {
    %c0_i32 = arith.constant 0 : i32
    return %arg0, %arg1 : i32, i32
  }
}

</mosaic_0001>

<bundles_post_ra>
// kernel: tpu_custom_call.1
= control target key start
LH: loop header
LB: loop body
LE: loop exit
PB: predicated region body
PF: predicated region fallthrough
CT: control target
= control target key end

     0   :  { %7 = vsyncpa [#allocation4], 0  ;;  %s265_s0 = inlined_call_operand.hbm [shape: f32[16,32], index: 0, kind: input, shape index: {}]   ;;  %s266_s1 = inlined_call_operand.hbm [shape: f32[32,96], index: 1, kind: input, shape index: {}]   ;;  %s267_s2 = inlined_call_operand.hbm [shape: f32[16,96], index: 2, kind: output, shape index: {}]  }
   0x1   :  { %8 = vsyncpa [#allocation7], 0 }
   0x2   :  { %9 = vsyncpa [#allocation5], 0  ;;  %s219_s9 = smov [#allocation3]  }
   0x3   :  { %s15_s10 = sshll.u32 %s219_s9, 4  ;;  %s16_s10 = int_to_ptr.vmem [resolvable:$true] %s15_s10 }
   0x4   :  { %s161_s11 = scalar_lea.vmem %s16_s10, 256  ;;  %p166_p1 = scmp.lt.s32.totalorder %s16_s10, %s16_s10 }
   0x5   :  { %p162_p0 = scmp.ne.s32.totalorder %s16_s10, %s161_s11  ;;  %p167_p2 = scmp.lt.s32.totalorder %s161_s11, %s161_s11 }
   0x7   :  { %p168_p3 = por %p167_p2, %p166_p1 }
   0x9   :  { %p169_p4 = pnand %p168_p3, %p162_p0 }
   0xb   :  { %172 = shalt.err (!%p169_p4)
}
   0xc   :  { %s220_s12 = smov 128   ;;  %s221_s13 = smov 8  }
   0xd   :  { %21 = dma.hbm_to_vmem [thread:$0]  %s265_s0, 256, %s16_s10, [#allocation4], %s220_s12, %s220_s12, %s221_s13  }
   0xe   :  { %s222_s16 = smov [#allocation6]  }
   0xf   :  { %s27_s17 = sshll.u32 %s222_s16, 4  ;;  %s28_s17 = int_to_ptr.vmem [resolvable:$true] %s27_s17 }
  0x10   :  { %s181_s18 = scalar_lea.vmem %s28_s17, 512  ;;  %p186_p6 = scmp.lt.s32.totalorder %s28_s17, %s28_s17 }
  0x11   :  { %p182_p5 = scmp.ne.s32.totalorder %s28_s17, %s181_s18  ;;  %p187_p7 = scmp.lt.s32.totalorder %s181_s18, %s181_s18 }
  0x13   :  { %p188_p8 = por %p187_p7, %p186_p6 }
  0x15   :  { %p189_p9 = pnand %p188_p8, %p182_p5 }
  0x17   :  { %192 = shalt.err (!%p189_p9)
}
  0x18   :  { %33 = dma.hbm_to_vmem [thread:$0]  %s266_s1, 512, %s28_s17, [#allocation7], %s220_s12, %s220_s12, %s221_s13  }
  0x19   :  { %213 = dma.done.wait [#allocation4], 256  }
  0x1a   :  { %214 = vsyncadd [#allocation4], 4294967040 }
  0x1b   :  { %215 = dma.done.wait [#allocation7], 512  }
  0x1c   :  { %216 = vsyncadd [#allocation7], 4294966784  ;;  %vm45_vm0 = vcmask 785408   ;;  %v223_v0 = vmov 0.0   ;;  %vm224_vm1 = vmmov 0   ;;  %v55_v1 = vld [vmem:[#allocation6 + $0x10] sm:$0xff] }
  0x1d   :  { %46 = vst.msk [vmem:[#allocation2] sm:$0xff] %vm45_vm0, %v223_v0  ;;  %47 = vst.msk [vmem:[#allocation2 + $0x8] sm:$0xff] %vm45_vm0, %v223_v0  ;;  %138 = vmatprep.subr.bf16.mxu0 %v223_v0  ;;  %142 = vmatprep.mubr.msk.bf16.mxu0 %vm224_vm1, %v223_v0  ;;  %v56_v2 = vld [vmem:[#allocation6 + $0x18] sm:$0xff]  ;;  %v53_v3 = vld [vmem:[#allocation6] sm:$0xff]  ;;  %vm59_vm2 = vcmask 261120   ;;  %s225_s0 = smov [#allocation8]  }
  0x1e   :  { %v58_v4 = vpack.c.bf16 %v56_v2, %v55_v1  ;;  %v54_v5 = vld [vmem:[#allocation6 + $0x8] sm:$0xff]  ;;  %v50_v7 = vld [vmem:[#allocation3] sm:$0xff]  ;;  %v51_v8 = vld [vmem:[#allocation3 + $0x8] sm:$0xff]  ;;  %s121_s1 = sshll.u32 %s225_s0, 4  ;;  %s122_s1 = int_to_ptr.vmem [resolvable:$true] %s121_s1 }
  0x1f   :  { %v57_v6 = vpack.c.bf16 %v54_v5, %v53_v3  ;;  %v52_v9 = vpack.c.bf16 %v51_v8, %v50_v7  ;;  %s193_s21 = scalar_lea.vmem %s122_s1, 256  ;;  %p198_p11 = scmp.lt.s32.totalorder %s122_s1, %s122_s1 }
  0x20   :  { %139 = vmatpush3.bf16.msra.mxu0 %v58_v4  ;;  %p194_p10 = scmp.ne.s32.totalorder %s122_s1, %s193_s21  ;;  %p199_p12 = scmp.lt.s32.totalorder %s193_s21, %s193_s21 }
  0x21   :  { %140 = vmatprep.subr.bf16.mxu0 %v223_v0 }
  0x22   :  { %p200_p13 = por %p199_p12, %p198_p11 }
  0x24   :  { %141 = vmatpush3.bf16.msra.mxu0 %v57_v6  ;;  %v48_v10 = vld [vmem:[#allocation2] sm:$0xff]  ;;  %v49_v14 = vld [vmem:[#allocation2 + $0x8] sm:$0xff]  ;;  %p201_p0 = pnand %p200_p13, %p194_p10 }
  0x27   :  { %143 = vmatmul.mubr.msk.bf16.vlgmr.msra.gmra.mxu0 %vm59_vm2, %v52_v9 }
  0xe7   :  { %v97_v11 = vpop.f32.mrf.mxu0 }
  0xe8   :  { %v104_v12 = vadd.f32 %v97_v11, %v48_v10 }
  0xe9   :  { %v144_v13 = vpop.f32.mrf.mxu0 }
  0xea   :  { %107 = vst.msk [vmem:[#allocation2] sm:$0xff] %vm45_vm0, %v104_v12 }
  0xeb   :  { %v100_v15 = vpop.f32.mrf.mxu0 }
  0xec   :  { %v105_v16 = vadd.f32 %v100_v15, %v49_v14 }
  0xed   :  { %v145_v17 = vpop.f32.mrf.mxu0 }
  0xee   :  { %108 = vst.msk [vmem:[#allocation2 + $0x8] sm:$0xff] %vm45_vm0, %v105_v16 }
  0xf1   :  { %v112_v18 = vld [vmem:[#allocation2] sm:$0xff] }
  0xf2   :  { %114 = vst.msk [vmem:[#allocation8] sm:$0xff] %vm45_vm0, %v112_v18 }
  0xf5   :  { %v113_v19 = vld [vmem:[#allocation2 + $0x8] sm:$0xff] }
  0xf6   :  { %115 = vst.msk [vmem:[#allocation8 + $0x8] sm:$0xff] %vm45_vm0, %v113_v19 }
  0xf7   :  { %204 = shalt.err (!%p201_p0)
}
  0xf8   :  { %127 = dma.vmem_to_hbm [thread:$0]  %s122_s1, 256, %s267_s2, [#allocation5], %s220_s12, %s220_s12, %s221_s13  }
  0xf9   :  { %217 = dma.done.wait [#allocation5], 256  }
  0xfa   :  { %218 = vsyncadd [#allocation5], 4294967040 }
  0xfb   :  { %131 = vsyncpa [#allocation4], 1 }
  0xfc   :  { %132 = vsyncpa [#allocation7], 1 }
  0xfd   :  { %133 = vsyncpa [#allocation5], 1 }

</bundles_post_ra>
